<compile_context>
chip_gen: v7x
topology: tpu7x:2x2x1
jax: 0.10.0
libtpu: 0.0.40
codegen_flags: <defaults>
</compile_context>

<pallas_src>
from typing import NamedTuple

import jax
import jax.numpy as jnp
from jax import lax
from jax.experimental import pallas as pl
from jax.experimental.pallas import tpu as pltpu


def _round_up(x, m):
    return ((x + m - 1) // m) * m


def _vmem_capacity_bytes():
    """Per-generation VMEM capacity; conservative fallback (v7x per-TC)."""
    try:
        info = pltpu.get_tpu_info()
        cap = getattr(info, "vmem_capacity_bytes", None)
        if cap:
            return int(cap)
    except Exception:
        pass
    return 64 << 20


class _Plan(NamedTuple):
    b_tile: int          # batch elements per grid step
    g: int               # batch elements per MXU matmul (group)
    n_groups: int        # groups per grid step (b_tile // g)
    contract_last: bool  # True: Gram over rows (N<=M); False: Gram over cols (M<N)
    num_blocks: int      # grid size
    pad: int             # zero-padded batch elements
    vmem_limit: int      # bytes for CompilerParams.vmem_limit_bytes


def _plan(B, N, M, dtype):
    itemsize = jnp.dtype(dtype).itemsize
    sub = max(8, 32 // max(itemsize, 1))          # sublane packing: 8 f32 / 16 bf16 / 32 i8
    # Padded, double-buffered input block bytes per batch element.
    in_elem = 2 * _round_up(N, sub) * _round_up(M, 128) * itemsize

    contract_last = N <= M
    k = N if contract_last else M                 # Gram side per element

    # ~256 LHS rows fill the v6e/v7x MXU (two passes on v5e's 128-wide MXU).
    # Only group when merging (g, N) -> (g*N,) is sublane-aligned (free relayout);
    # grouping the M < N case would need a real transpose, so it stays per-element.
    if contract_last and N % sub == 0:
        g_nom = max(1, 256 // k)
    else:
        g_nom = 1

    cap = _vmem_capacity_bytes()
    block_budget = int(cap * 0.35)                # double-buffered blocks + live temps
    vmem_limit = max(32 << 20, min(int(cap * 0.75), 100 << 20))

    rows = g_nom * k
    # One live Gram + its squared/masked temps (f32, padded) + (8,128) out block x2.
    fixed = 3 * _round_up(rows, 8) * _round_up(rows, 128) * 4 + 2 * 8 * 128 * 4
    # TODO(synk): add an M-chunk reduction grid axis ("arbitrary", last) with a VMEM
    # Gram accumulator for shapes where even one (N, M) element exceeds the budget.
    avail = max(in_elem, block_budget - fixed)
    max_by_vmem = max(1, avail // in_elem)

    # Keep >= min(B, 4) grid steps: pipeline overlap + megacore (v7x) sharding.
    target_blocks = min(B, 4)
    max_by_parallel = max(1, -(-B // target_blocks))
    b_tile = int(max(1, min(max_by_vmem, max_by_parallel)))

    g = min(g_nom, b_tile)
    if g > 1:
        b_tile = (b_tile // g) * g                # whole groups per block
    n_groups = b_tile // g

    B_pad = _round_up(B, b_tile)
    pad = B_pad - B
    num_blocks = B_pad // b_tile
    return _Plan(b_tile, g, n_groups, contract_last, num_blocks, pad, vmem_limit)


def _make_kernel(b_tile, n, m, g, n_groups, contract_last):
    k = n if contract_last else m
    rows = g * k
    extra_per_elem = float(n - k)   # (N - M) correction when the Gram is M x M

    def kernel(w_ref, out_ref):
        # w_ref : (b_tile, N, M) block in the input's native dtype.
        # out_ref: (1, 8, 128) f32 block; filled with this step's partial loss.

        # Hoisted once per block: identity and block-diagonal masks over the Gram.
        r = lax.broadcasted_iota(jnp.int32, (rows, rows), 0)
        c = lax.broadcasted_iota(jnp.int32, (rows, rows), 1)
        eye = (r == c).astype(jnp.float32)
        same_block = (r // k == c // k) if g > 1 else None

        def group_loss(gi, acc):
            if contract_last and g > 1:
                # Fuse g elements into one MXU matmul: (g*N, M) contracted on M.
                wg = w_ref[pl.ds(gi * g, g)]                     # (g, N, M)
                wf = wg.reshape(rows, m)                         # (g*N, M)
                gram = lax.dot_general(
                    wf, wf, (((1,), (1,)), ((), ())),
                    preferred_element_type=jnp.float32)          # (g*N, g*N)
            elif contract_last:
                wf = w_ref[gi]                                   # (N, M)
                gram = lax.dot_general(
                    wf, wf, (((1,), (1,)), ((), ())),
                    preferred_element_type=jnp.float32)          # (N, N)
            else:
                # M < N: contract over rows -> M x M Gram, no transpose needed.
                wf = w_ref[gi]                                   # (N, M)
                gram = lax.dot_general(
                    wf, wf, (((0,), (0,)), ((), ())),
                    preferred_element_type=jnp.float32)          # (M, M)

            resid = gram - eye
            sq = resid * resid
            if g > 1:
                # Keep only the per-element block-diagonal tiles of the big Gram.
                sq = jnp.where(same_block, sq, 0.0)
            return acc + jnp.sum(sq)

        init = jnp.zeros((), jnp.float32)
        if n_groups == 1:
            total = group_loss(0, init)
        else:
            total = lax.fori_loop(0, n_groups, group_loss, init,
                                  unroll=(n_groups <= 8))

        block_loss = total + jnp.float32(b_tile * extra_per_elem)
        # Lane-dense, unmasked store; only [0, 0, 0] is read back outside.
        out_ref[...] = jnp.broadcast_to(block_loss, out_ref.shape).astype(jnp.float32)

    return kernel


def orthogonal_regularizer(w):
    """w: (B, N, M) array. Returns scalar float32 loss matching the PyTorch module."""
    B, N, M = w.shape
    plan = _plan(B, N, M, w.dtype)

    if plan.pad:
        # Zero pad elements each contribute exactly N; subtracted after the sum.
        w = jnp.pad(w, ((0, plan.pad), (0, 0), (0, 0)))

    kernel = _make_kernel(plan.b_tile, N, M, plan.g, plan.n_groups, plan.contract_last)

    out = pl.pallas_call(
        kernel,
        out_shape=jax.ShapeDtypeStruct((plan.num_blocks, 8, 128), jnp.float32),
        grid_spec=pltpu.PrefetchScalarGridSpec(
            num_scalar_prefetch=0,
            grid=(plan.num_blocks,),
            in_specs=[
                # b_tile full (N, M) batch elements per grid step.
                pl.BlockSpec((plan.b_tile, N, M), lambda b: (b, 0, 0)),
            ],
            # One private (8, 128)-aligned partial-loss block per grid step.
            out_specs=pl.BlockSpec((1, 8, 128), lambda b: (b, 0, 0)),
        ),
        compiler_params=pltpu.CompilerParams(
            dimension_semantics=("parallel",),     # independent per-block partials
            vmem_limit_bytes=plan.vmem_limit,
        ),
    )(w)

    loss = jnp.sum(out[:, 0, 0])
    if plan.pad:
        loss = loss - jnp.float32(plan.pad * N)
    return loss


def _reference(w):
    B, N, _ = w.shape
    wf = w.astype(jnp.float32)
    e = jnp.broadcast_to(jnp.eye(N, dtype=jnp.float32), (B, N, N))
    m = e - jnp.einsum("bnm,bkm->bnk", wf, wf)
    return jnp.sum(m * m)


if __name__ == "__main__":
    key = jax.random.PRNGKey(0)
    cases = [
        (2, 8, 32),    # tiny batch, N <= M, per-element path
        (12, 8, 32),   # grouped MXU path (g > 1, block-diag mask), 4 parallel blocks
        (5, 8, 32),    # awkward batch size -> zero-padding path
        (4, 64, 16),   # M < N: M x M Gram + (N - M) correction
    ]
    ok = True
    for i, (b, n, m) in enumerate(cases):
        k = jax.random.fold_in(key, i)
        w = jax.random.normal(k, (b, n, m), dtype=jnp.float32)
        loss = jax.block_until_ready(orthogonal_regularizer(w))
        ref = _reference(w)
        if not jnp.allclose(loss, ref, rtol=1e-4, atol=1e-2):
            ok = False
            print("MISMATCH", (b, n, m), float(loss), float(ref))
    assert ok
    print("KERNEL_OK")
</pallas_src>

<mosaic_0001>
module attributes {stable_mosaic.version = 11 : i64} {
  func.func @kernel(%arg0: i32, %arg1: memref<1x8x32xf32, #tpu.memory_space<vmem>>, %arg2: memref<1x8x128xf32, #tpu.memory_space<vmem>>) attributes {dimension_semantics = [#tpu.dimension_semantics<parallel>], iteration_bounds = array<i64: 2>, scalar_prefetch = 0 : i64, scratch_operands = 0 : i64, tpu.core_type = #tpu.core_type<tc>, window_params = [{transform_indices = @transform_0, window_bounds = array<i64: 1, 8, 32>}, {transform_indices = @transform_1, window_bounds = array<i64: 1, 8, 128>}]} {
    %0 = tpu.iota {dimensions = array<i32: 0>} : vector<8x8xi32>
    %1 = tpu.iota {dimensions = array<i32: 1>} : vector<8x8xi32>
    %2 = arith.cmpi eq, %0, %1 : vector<8x8xi32>
    %3 = arith.extui %2 : vector<8x8xi1> to vector<8x8xi32>
    %4 = arith.sitofp %3 : vector<8x8xi32> to vector<8x8xf32>
    %c0 = arith.constant 0 : index
    %c0_0 = arith.constant 0 : index
    %c0_1 = arith.constant 0 : index
    %5 = vector.load %arg1[%c0, %c0_0, %c0_1] : memref<1x8x32xf32, #tpu.memory_space<vmem>>, vector<1x8x32xf32>
    %6 = vector.shape_cast %5 : vector<1x8x32xf32> to vector<8x32xf32>
    %cst = arith.constant dense<0.000000e+00> : vector<8x8xf32>
    %7 = tpu.matmul %6, %6, %cst {dimension_numbers = #tpu.dot_dimension_numbers<[1], [1], [0], [0], [0, 0, 1, 0], [], []>} : vector<8x32xf32>, vector<8x32xf32>, vector<8x8xf32> -> vector<8x8xf32>
    %8 = arith.subf %7, %4 : vector<8x8xf32>
    %9 = arith.mulf %8, %8 : vector<8x8xf32>
    %10 = vector.shape_cast %9 : vector<8x8xf32> to vector<1x8x8xf32>
    %cst_2 = arith.constant dense<0.000000e+00> : vector<1xf32>
    %11 = vector.multi_reduction <add>, %10, %cst_2 [1, 2] : vector<1x8x8xf32> to vector<1xf32>
    %12 = vector.shape_cast %11 : vector<1xf32> to vector<1x1x1xf32>
    %13 = vector.extract %12[0, 0, 0] : f32 from vector<1x1x1xf32>
    %cst_3 = arith.constant 0.000000e+00 : f32
    %14 = arith.addf %cst_3, %13 : f32
    %cst_4 = arith.constant 0.000000e+00 : f32
    %15 = arith.addf %14, %cst_4 : f32
    %16 = vector.broadcast %15 : f32 to vector<1x8x128xf32>
    %c0_5 = arith.constant 0 : index
    %c0_6 = arith.constant 0 : index
    %c0_7 = arith.constant 0 : index
    %17 = vector.load %arg2[%c0_5, %c0_6, %c0_7] : memref<1x8x128xf32, #tpu.memory_space<vmem>>, vector<1x8x128xf32>
    tpu.vector_store %arg2[%c0_5, %c0_6, %c0_7], %16 {strides = array<i32>} : memref<1x8x128xf32, #tpu.memory_space<vmem>>, vector<1x8x128xf32>,
    return
  }
  func.func @transform_0(%arg0: i32) -> (i32, i32, i32) {
    %c0_i32 = arith.constant 0 : i32
    %c0_i32_0 = arith.constant 0 : i32
    %c0_i32_1 = arith.constant 0 : i32
    return %arg0, %c0_i32, %c0_i32_0 : i32, i32, i32
  }
  func.func @transform_1(%arg0: i32) -> (i32, i32, i32) {
    %c0_i32 = arith.constant 0 : i32
    %c0_i32_0 = arith.constant 0 : i32
    %c0_i32_1 = arith.constant 0 : i32
    return %arg0, %c0_i32, %c0_i32_0 : i32, i32, i32
  }
}

</mosaic_0001>

<bundles_post_ra>
// kernel: tpu_custom_call.1
= control target key start
LH: loop header
LB: loop body
LE: loop exit
PB: predicated region body
PF: predicated region fallthrough
CT: control target
= control target key end

     0   :  { %6 = vsyncpa [#allocation3], 0  ;;  %s664_s0 = inlined_call_operand.hbm [shape: f32[2,8,32], index: 0, kind: input, shape index: {}]   ;;  %s665_s1 = inlined_call_operand.hbm [shape: f32[2,8,128], index: 1, kind: output, shape index: {}]  }
   0x1   :  { %8 = vsyncpa [#allocation3 + $0x1], 0 }
   0x2   :  { %9 = vsyncpa [#allocation4], 0 }
   0x3   :  { %11 = vsyncpa [#allocation4 + $0x1], 0  ;;  %s499_s6 = smov 0   ;;  %s501_s7 = smov 0  }
   0x4   :  { %s503_s8 = smov 0   ;;  %s505_s9 = smov 0  }
   0x5 LB: > { %s520_s10 = sadd.s32 4294967295, %s483_s9   ;;  %s315_s11 = sadd.s32 4294967294, %s483_s9   ;;  %s483_s9 = sphi %s505_s9, %s680_s9   ;;  %s479_s8 = sphi %s503_s8, %s679_s8   ;;  %s475_s7 = sphi %s501_s7, %s678_s7   ;;  %s471_s6 = sphi %s499_s6, %s677_s6  }
   0x6   : > { %s524_s12 = sadd.s32 1, %s483_s9   ;;  %s24_s13 = sadd.s32 1, %s479_s8 }
   0x7   : > { %s21_s14 = ssub.s32 %s483_s9, %s524_s12  ;;  %p31_p0 = scmp.ne.s32.totalorder %s479_s8, %s475_s7 }
   0x8   : > { %p22_p1 = scmp.eq.s32.totalorder %s21_s14, 0  ;;  %p32_p2 = scmp.eq.s32.totalorder %s483_s9, 0 }
   0x9   : > { %p37_p3 = scmp.ne.s32.totalorder %s475_s7, %s471_s6  ;;  %p38_p4 = scmp.eq.s32.totalorder %s520_s10, 0 }
   0xa   : > { %s536_s15 = scalar_select %p22_p1, %s479_s8, %s24_s13  }
   0xb   : > { %p538_p5 = por %p32_p2, %p31_p0  ;;  %p542_p6 = por %p38_p4, %p37_p3 }
   0xc   : > { %p61_p7 = scmp.eq.s32.totalorder %s520_s10, 1  ;;  %p67_p8 = scmp.eq.s32.totalorder %s315_s11, 1 }
   0xd   : > { %p351_p10 = scmp.lt.s32.totalorder %s483_s9, 2  ;;  %s87_s20 = sand.u32 1, %s479_s8  }
   0xe   : > { %p549_p11 = por %p61_p7, %p31_p0  ;;  %p553_p12 = por %p67_p8, %p37_p3 }
   0xf   : > { %s319_s21 = sshll.u32 %s483_s9, 7  ;;  %s318_s22 = sshll.u32 %s87_s20, 3 }
  0x10   : > { %s669_s18 = scalar_select %p549_p11, 1, 0 }
  0x11   : > { %s670_s19 = scalar_select %p553_p12, 1, 0 }
  0x12   : > { %s562_s25 = scalar_lea.hbm %s664_s0, %s319_s21  ;;  %s91_s26 = scalar_lea.vmem [#allocation2], %s318_s22 }
  0x13   : > { %s98_s27 = sshll.u32 %s91_s26, 4  ;;  %p566_p13 = pnand %p351_p10, %p538_p5  ;;  %s570_s27 = int_to_ptr.vmem [resolvable:$true] %s98_s27 }
  0x14   : > { %s88_s29 = scalar_lea.sflag [#allocation3], %s87_s20  ;;  %s387_s30 = scalar_lea.hbm %s562_s25, 128 }
  0x15   : > { %p388_p2 = scmp.ne.s32.totalorder %s562_s25, %s387_s30  ;;  %p389_p3 = pneg %p566_p13 }
  0x16   : > { %s392_s4 = scalar_lea.hbm %s664_s0, 256  ;;  %p393_p5 = scmp.lt.u32.totalorder %s562_s25, %s664_s0 }
  0x17   : > { %p390_p4 = pnand %p389_p3, %p388_p2  ;;  %p394_p8 = scmp.lt.u32.totalorder %s392_s4, %s387_s30 }
  0x18   : > { %p396_p9 = scmp.lt.u32.totalorder %s387_s30, %s562_s25 }
  0x19   : > { %p391_p7 = pneg %p390_p4  ;;  %p395_p10 = por %p394_p8, %p393_p5 }
  0x1b   : > { %p397_p0 = por %p396_p9, %p395_p10 }
  0x1d   : > { %p398_p1 = pnand %p397_p0, %p391_p7 }
  0x1f   : > { %401 = shalt.err (!%p398_p1)
}
  0x20   : > { %s402_s13 = scalar_lea.vmem %s570_s27, 128  ;;  %s485_s14 = smov [#allocation2]  }
  0x21   : > { %p403_p2 = scmp.ne.s32.totalorder %s570_s27, %s402_s13  ;;  %s407_s16 = sshll.u32 %s485_s14, 4  ;;  %s408_s16 = int_to_ptr.vmem [resolvable:$false] %s407_s16 }
  0x22   : > { %s409_s20 = scalar_lea.vmem %s408_s16, 256  ;;  %p410_p11 = scmp.lt.s32.totalorder %s570_s27, %s408_s16 }
  0x23   : > { %p405_p4 = pnand %p403_p2, %p389_p3  ;;  %p411_p5 = scmp.lt.s32.totalorder %s409_s20, %s402_s13 }
  0x25   : > { %p406_p12 = pneg %p405_p4  ;;  %p412_p8 = por %p411_p5, %p410_p11 }
  0x27   : > { %p413_p9 = pnand %p412_p8, %p406_p12 }
  0x29   : > { %416 = shalt.err (!%p413_p9)
}
  0x2a   : > { %346 = dma.hbm_to_vmem [thread:$0]  (!%p566_p13), %s562_s25, 128, %s570_s27, %s88_s29  }
  0x2b   : > { %p672_p0 = scmp.lt.s32.totalorder %s483_s9, 3  ;;  %p673_p1 = scmp.ge.s32.totalorder %s483_s9, 1 }
  0x2d   : > { %p104_p3 = pnand %p673_p1, %p672_p0 }
  0x2e   : > { %s604_s21 = sand.u32 (!%p104_p3), 1, %s475_s7  }
  0x2f   : > { %107 = sbr.rel (%p104_p3) target bundleno = 496 (0x1f0), region = 24  ;;  %s321_s22 = sshll.u32 (!%p104_p3), %s604_s21, 3 }
  0x30   : > { %s110_s23 = scalar_lea.sflag (!%p104_p3), [#allocation3], %s604_s21  ;;  %s113_s24 = scalar_lea.vmem (!%p104_p3), [#allocation2], %s321_s22 }
  0x36   : > { %462 = dma.done.wait (%p542_p6), %s110_s23, 128  }
  0x37   : > { %464 = vsyncadd (%p542_p6), %s110_s23, 4294967168  ;;  %v486_v0 = vmov 0.0   ;;  %vm487_vm0 = vmmov 0   ;;  %vm140_vm1 = vcmask 261120   ;;  %v139_v1 = vld [vmem:[%s113_s24] sm:$0xff]  ;;  %v132_v2 = vlaneseq  ;;  %s131_s17 = scalar_lea.vmem [#allocation5], %s321_s22 }
  0x38   : > { %332 = vmatprep.subr.mxu0 %v486_v0  ;;  %334 = vmatprep.mubr.msk.f32.mxu0 %vm487_vm0, %v486_v0  ;;  %vm216_vm3 = vcmask 64512   ;;  %s245_s25 = sshll.u32 %s131_s17, 4  ;;  %s327_s26 = sshll.u32 %s520_s10, 7  ;;  %s617_s25 = int_to_ptr.vmem [resolvable:$true] %s245_s25 }
  0x39   : > { %333 = vmatpush3.xpose.msk.msra.mxu0 %vm140_vm1, %v139_v1  ;;  %v133_v3 = vshrl.u32 %v132_v2, 7  ;;  %v135_v4 = vand.u32 127, %v132_v2  ;;  %s622_s30 = scalar_lea.hbm %s665_s1, %s327_s26  ;;  %s232_s2 = scalar_lea.sflag [#allocation4], %s604_s21 }
  0x3a   : > { %s417_s3 = scalar_lea.vmem %s617_s25, 128  ;;  %p674_p11 = scmp.ne.s32.totalorder %s669_s18, 0 }
  0x3b   : > { %vm136_vm2 = vcmp.eq.s32.totalorder %v133_v3, %v135_v4  ;;  %p418_p6 = scmp.ne.s32.totalorder %s617_s25, %s417_s3  ;;  %s488_s10 = smov [#allocation5]  }
  0x3c   : > { %335 = vmatmul.mubr.msk.f32.vlgmr.msra.gmra.mrb[0].mxu0 %vm140_vm1, %v139_v1  ;;  %v323_v5 = vsel %vm136_vm2, 1.0, %v486_v0  ;;  %s421_s4 = sshll.u32 %s488_s10, 4  ;;  %s422_s4 = int_to_ptr.vmem [resolvable:$false] %s421_s4 }
  0x3d   : > { %p419_p12 = pnand %p418_p6, %p674_p11  ;;  %s423_s5 = scalar_lea.vmem %s422_s4, 256 }
  0x3e   : > { %p424_p7 = scmp.lt.s32.totalorder %s617_s25, %s422_s4  ;;  %p425_p10 = scmp.lt.s32.totalorder %s423_s5, %s417_s3 }
  0x3f   : > { %p420_p13 = pneg %p419_p12 }
  0x40   : > { %p426_p2 = por %p425_p10, %p424_p7 }
  0x42   : > { %p427_p4 = pnand %p426_p2, %p420_p13 }
 0x10f   : > { %v210_v6 = vpop.f32.mrb[0].mxu0 }
 0x110   : > { %v214_v7 = vsub.f32 %v210_v6, %v323_v5  ;;  %v336_v8 = vpop.f32.mrb[1].mxu0 }
 0x112   : > { %v215_v9 = vmul.f32 %v214_v7, %v214_v7 }
 0x114   : > { %v217_v10 = vsel %vm216_vm3, %v215_v9, 0.0 }
 0x115   : > { %218 = vadd.xlane.f32.xlu0 %v217_v10 }
 0x1a2   : > { %v219_v11 = vpop.xlane.xlu0 %218 }
 0x1a3   : > { %v220_v12 = vrot.slane %v219_v11, 4 }
 0x1a5   : > { %v221_v13 = vadd.f32 %v220_v12, %v219_v11 }
 0x1a7   : > { %v222_v14 = vrot.slane %v221_v13, 2 }
 0x1a9   : > { %v223_v15 = vadd.f32 %v222_v14, %v221_v13 }
 0x1ab   : > { %v224_v16 = vrot.slane %v223_v15, 1 }
 0x1ad   : > { %v225_v17 = vadd.f32 %v224_v16, %v223_v15 }
 0x1af   : > { %337 = vpush %v225_v17 }
 0x1e0   : > { %s338_s27 = spop %337 }
 0x1e1   : > { %v229_v18 = vstv %s338_s27 }
 0x1e2   : > { %230 = vst [vmem:[%s131_s17] sm:$0xff] %v229_v18 }
 0x1e3   : > { %430 = shalt.err (!%p427_p4)
}
 0x1e4   : > { %s431_s11 = scalar_lea.hbm %s622_s30, 128  ;;  %s435_s16 = scalar_lea.hbm %s665_s1, 256 }
 0x1e5   : > { %p432_p5 = scmp.ne.s32.totalorder %s622_s30, %s431_s11  ;;  %p436_p0 = scmp.lt.u32.totalorder %s622_s30, %s665_s1 }
 0x1e6   : > { %p437_p1 = scmp.lt.u32.totalorder %s435_s16, %s431_s11  ;;  %p439_p6 = scmp.lt.u32.totalorder %s431_s11, %s622_s30 }
 0x1e7   : > { %p433_p8 = pnand %p432_p5, %p674_p11 }
 0x1e8   : > { %p438_p3 = por %p437_p1, %p436_p0 }
 0x1e9   : > { %p434_p9 = pneg %p433_p8 }
 0x1ea   : > { %p440_p12 = por %p439_p6, %p438_p3 }
 0x1ec   : > { %p441_p13 = pnand %p440_p12, %p434_p9 }
 0x1ee   : > { %444 = shalt.err (!%p441_p13)
}
 0x1ef   : > { %341 = dma.vmem_to_hbm [thread:$0]  (%p674_p11), %s617_s25, 128, %s622_s30, %s232_s2  }
 0x1f0 PF: > { %s257_s22 = sand.u32 1, %s471_s6   ;;  %p675_p7 = scmp.ne.s32.totalorder %s670_s19, 0 }
 0x1f1   : > { %p676_p10 = scmp.ge.s32.totalorder %s483_s9, 2  ;;  %s258_s23 = scalar_lea.sflag [#allocation4], %s257_s22 }
 0x1f3   : > { %p348_p2 = pnand %p676_p10, %p675_p7 }
 0x1f5   : > { %466 = dma.done.wait (!%p348_p2), %s258_s23, 128  }
 0x1f6   : > { %468 = vsyncadd (!%p348_p2), %s258_s23, 4294967168  ;;  %p14_p4 = scmp.ge.s32.totalorder %s524_s12, 4   ;;  %s677_s6 = smov %s475_s7 }
 0x1f7   : > { %s678_s7 = smov %s479_s8  ;;  %s679_s8 = smov %s536_s15 }
 0x1f8   : > { %s680_s9 = smov %s524_s12  ;;  %16 = sbr.rel (!%p14_p4) target bundleno = 5 (0x5), region = 69 }
 0x1ff   :  { %263 = vsyncpa [#allocation3], 1 }
 0x200   :  { %265 = vsyncpa [#allocation3 + $0x1], 1 }
 0x201   :  { %266 = vsyncpa [#allocation4], 1 }
 0x202   :  { %268 = vsyncpa [#allocation4 + $0x1], 1 }

</bundles_post_ra>
